<compile_context>
chip_gen: v6e
topology: v6e:2x2x1
jax: 0.10.0
libtpu: 0.0.40
codegen_flags: <defaults>
</compile_context>

<pallas_src>
import jax
import jax.numpy as jnp
import numpy as np
from jax.experimental import pallas as pl
from jax.experimental.pallas import tpu as pltpu

_LANES = 128


def _ceil_div(a, b):
    return -(-a // b)


def _surface_loss_kernel(x_ref, d_ref, o_ref):
    """One grid step processes a (N, C, sb, 128) slab of the spatial axis.

    Softmax is over the channel axis (axis=1), local to every spatial
    position, so spatial tiling is exact.  Lane-wide partial sums accumulate
    directly into the resident output block (index_map ignores the reduction
    axis), so no VMEM scratch and no per-step cross-lane reduction is needed.
    """
    s_idx = pl.program_id(1)

    @pl.when(s_idx == 0)
    def _init():
        o_ref[...] = jnp.zeros_like(o_ref)

    x = x_ref[...].astype(jnp.float32)              # (N, C, sb, 128)
    d = d_ref[...].astype(jnp.float32)              # (N, C, sb, 128)

    # numerically-stable softmax over channels -- pure VPU (+ EUP exp/rcp)
    m = jnp.max(x, axis=1, keepdims=True)
    e = jnp.exp(x - m)
    p = e * pl.reciprocal(jnp.sum(e, axis=1, keepdims=True), approx=True)

    # channel-sum only; sublane/lane reduction is deferred to the wrapper
    o_ref[...] += jnp.sum(p * d, axis=1)[None]      # (1, N, sb, 128)


def surface_loss(x, distmap, *, spatial_block_rows=16, num_splits=2):
    """x, distmap: (N, C, H, W) f32 or bf16.  Returns (N,) float32."""
    N, C, H, W = x.shape
    assert distmap.shape == x.shape
    S = H * W
    itemsize = jnp.dtype(x.dtype).itemsize

    # ---- tiling ----------------------------------------------------------
    R = _ceil_div(S, _LANES)                 # 128-lane rows of the spatial axis

    # cap the tile so (2 inputs x 2 pipeline buffers) stay within a VMEM budget
    budget = 16 << 20
    per_row_bytes = 2 * 2 * N * C * _LANES * itemsize
    max_rows = max(8, (budget // per_row_bytes) // 8 * 8)
    sb = max(8, (min(spatial_block_rows, max_rows) // 8) * 8)

    if R <= sb:
        sb, splits, steps = R, 1, 1          # one block covers all rows
    else:
        blocks = _ceil_div(R, sb)
        splits = max(1, min(num_splits, blocks))
        steps = _ceil_div(blocks, splits)

    R_pad = splits * steps * sb
    S_pad = R_pad * _LANES

    xf = x.reshape(N, C, S)
    df = distmap.reshape(N, C, S)
    if S_pad != S:
        # zero padding: softmax(0-pad) = 1/C but distmap pad = 0, so padded
        # positions contribute 0 and the exact denominator C*S stays correct.
        pad = ((0, 0), (0, 0), (0, S_pad - S))
        xf = jnp.pad(xf, pad)
        df = jnp.pad(df, pad)
    xf = xf.reshape(N, C, R_pad, _LANES)
    df = df.reshape(N, C, R_pad, _LANES)

    # ---- VMEM / cost bookkeeping ------------------------------------------
    in_tile_bytes = N * C * sb * _LANES * itemsize
    out_tile_bytes = N * sb * _LANES * 4
    vmem_need = 2 * 2 * in_tile_bytes + 2 * out_tile_bytes
    vmem_limit = int(min(max(2 * vmem_need + (2 << 20), 32 << 20), 48 << 20))

    cost = pl.CostEstimate(
        flops=6 * N * C * S_pad,
        transcendentals=N * C * S_pad,
        bytes_accessed=2 * N * C * S_pad * itemsize + splits * N * sb * _LANES * 4,
    )

    in_spec = pl.BlockSpec(
        (N, C, sb, _LANES), lambda p, s: (0, 0, p * steps + s, 0)
    )

    partial = pl.pallas_call(
        _surface_loss_kernel,
        out_shape=jax.ShapeDtypeStruct((splits, N, sb, _LANES), jnp.float32),
        grid_spec=pltpu.PrefetchScalarGridSpec(
            num_scalar_prefetch=0,
            grid=(splits, steps),
            in_specs=[in_spec, in_spec],
            out_specs=pl.BlockSpec((1, N, sb, _LANES), lambda p, s: (p, 0, 0, 0)),
        ),
        compiler_params=pltpu.CompilerParams(
            dimension_semantics=("parallel", "arbitrary"),
            vmem_limit_bytes=vmem_limit,
        ),
        cost_estimate=cost,
    )(xf, df)

    # tiny final reduction + mean normalization (exact original denom C*S)
    return jnp.sum(partial, axis=(0, 2, 3)) * (1.0 / (C * S))


def surface_loss_ref(x, distmap):
    """Pure-JAX reference mirroring the PyTorch forward (f32 compute)."""
    N, C = x.shape[:2]
    p = jax.nn.softmax(x.astype(jnp.float32), axis=1)
    score = p.reshape(N, C, -1) * distmap.astype(jnp.float32).reshape(N, C, -1)
    return jnp.mean(jnp.mean(score, axis=2), axis=1)


if __name__ == "__main__":
    key = jax.random.PRNGKey(0)
    kx, kd = jax.random.split(key)

    # TODO(synk): the PyTorch module also stashes `self.weight_map = distmap`;
    # that is a Python-side attribute with no compute, so it is omitted here.

    # 1) base case at the module's small shape
    N, C, H, W = 2, 4, 16, 16
    x = jax.random.normal(kx, (N, C, H, W), dtype=jnp.float32)
    distmap = jax.random.uniform(kd, (N, C, H, W), dtype=jnp.float32)
    out = jax.block_until_ready(surface_loss(x, distmap))
    ref = jax.block_until_ready(surface_loss_ref(x, distmap))
    np.testing.assert_allclose(np.asarray(out), np.asarray(ref),
                               rtol=5e-3, atol=5e-4)

    # 2) non-aligned spatial size -> exercises zero padding, the 2-way
    #    parallel split and a multi-step reduction (steps > 1).
    N2, C2, H2, W2 = 2, 3, 48, 48
    x2 = jax.random.normal(kx, (N2, C2, H2, W2), dtype=jnp.float32)
    d2 = jax.random.uniform(kd, (N2, C2, H2, W2), dtype=jnp.float32)
    out2 = jax.block_until_ready(surface_loss(x2, d2, spatial_block_rows=8))
    ref2 = jax.block_until_ready(surface_loss_ref(x2, d2))
    np.testing.assert_allclose(np.asarray(out2), np.asarray(ref2),
                               rtol=5e-3, atol=5e-4)

    # 3) bf16 inputs (half the HBM traffic; kernel upcasts to f32 internally)
    xb = x.astype(jnp.bfloat16)
    db = distmap.astype(jnp.bfloat16)
    out3 = jax.block_until_ready(surface_loss(xb, db))
    ref3 = jax.block_until_ready(surface_loss_ref(xb, db))
    np.testing.assert_allclose(np.asarray(out3), np.asarray(ref3),
                               rtol=1e-2, atol=1e-3)

    print("KERNEL_OK")
</pallas_src>

<mosaic_0001>
module attributes {stable_mosaic.version = 11 : i64} {
  func.func @_surface_loss_kernel(%arg0: i32, %arg1: i32, %arg2: memref<2x4x2x128xf32, #tpu.memory_space<vmem>>, %arg3: memref<2x4x2x128xf32, #tpu.memory_space<vmem>>, %arg4: memref<1x2x2x128xf32, #tpu.memory_space<vmem>>) attributes {dimension_semantics = [#tpu.dimension_semantics<parallel>, #tpu.dimension_semantics<arbitrary>], iteration_bounds = array<i64: 1, 1>, scalar_prefetch = 0 : i64, scratch_operands = 0 : i64, tpu.core_type = #tpu.core_type<tc>, window_params = [{transform_indices = @transform_0, window_bounds = array<i64: 2, 4, 2, 128>}, {transform_indices = @transform_1, window_bounds = array<i64: 2, 4, 2, 128>}, {transform_indices = @transform_2, window_bounds = array<i64: 1, 2, 2, 128>}]} {
    %c0_i32 = arith.constant 0 : i32
    %0 = arith.cmpi eq, %arg1, %c0_i32 : i32
    %1 = arith.extui %0 : i1 to i32
    %c0_i32_0 = arith.constant 0 : i32
    %2 = arith.cmpi ne, %1, %c0_i32_0 : i32
    scf.if %2 {
      %cst_18 = arith.constant 0.000000e+00 : f32
      %21 = vector.broadcast %cst_18 : f32 to vector<1x2x2x128xf32>
      %c0_19 = arith.constant 0 : index
      %c0_20 = arith.constant 0 : index
      %c0_21 = arith.constant 0 : index
      %c0_22 = arith.constant 0 : index
      %22 = vector.load %arg4[%c0_19, %c0_20, %c0_21, %c0_22] : memref<1x2x2x128xf32, #tpu.memory_space<vmem>>, vector<1x2x2x128xf32>
      tpu.vector_store %arg4[%c0_19, %c0_20, %c0_21, %c0_22], %21 {strides = array<i32>} : memref<1x2x2x128xf32, #tpu.memory_space<vmem>>, vector<1x2x2x128xf32>,
    } else {
    }
    %c0 = arith.constant 0 : index
    %c0_1 = arith.constant 0 : index
    %c0_2 = arith.constant 0 : index
    %c0_3 = arith.constant 0 : index
    %3 = vector.load %arg2[%c0, %c0_1, %c0_2, %c0_3] : memref<2x4x2x128xf32, #tpu.memory_space<vmem>>, vector<2x4x2x128xf32>
    %c0_4 = arith.constant 0 : index
    %c0_5 = arith.constant 0 : index
    %c0_6 = arith.constant 0 : index
    %c0_7 = arith.constant 0 : index
    %4 = vector.load %arg3[%c0_4, %c0_5, %c0_6, %c0_7] : memref<2x4x2x128xf32, #tpu.memory_space<vmem>>, vector<2x4x2x128xf32>
    %cst = arith.constant dense<0xFF800000> : vector<2x2x128xf32>
    %5 = vector.multi_reduction <maximumf>, %3, %cst [1] : vector<2x4x2x128xf32> to vector<2x2x128xf32>
    %6 = vector.shape_cast %5 : vector<2x2x128xf32> to vector<2x1x2x128xf32>
    %7 = vector.broadcast %6 : vector<2x1x2x128xf32> to vector<2x4x2x128xf32>
    %8 = arith.subf %3, %7 : vector<2x4x2x128xf32>
    %9 = math.exp %8 : vector<2x4x2x128xf32>
    %cst_8 = arith.constant dense<0.000000e+00> : vector<2x2x128xf32>
    %10 = vector.multi_reduction <add>, %9, %cst_8 [1] : vector<2x4x2x128xf32> to vector<2x2x128xf32>
    %11 = vector.shape_cast %10 : vector<2x2x128xf32> to vector<2x1x2x128xf32>
    %12 = tpu.reciprocal %11 {approx = true} : vector<2x1x2x128xf32> -> vector<2x1x2x128xf32>
    %13 = vector.broadcast %12 : vector<2x1x2x128xf32> to vector<2x4x2x128xf32>
    %14 = arith.mulf %9, %13 : vector<2x4x2x128xf32>
    %c0_9 = arith.constant 0 : index
    %c0_10 = arith.constant 0 : index
    %c0_11 = arith.constant 0 : index
    %c0_12 = arith.constant 0 : index
    %15 = vector.load %arg4[%c0_9, %c0_10, %c0_11, %c0_12] : memref<1x2x2x128xf32, #tpu.memory_space<vmem>>, vector<1x2x2x128xf32>
    %16 = arith.mulf %14, %4 : vector<2x4x2x128xf32>
    %cst_13 = arith.constant dense<0.000000e+00> : vector<2x2x128xf32>
    %17 = vector.multi_reduction <add>, %16, %cst_13 [1] : vector<2x4x2x128xf32> to vector<2x2x128xf32>
    %18 = vector.shape_cast %17 : vector<2x2x128xf32> to vector<1x2x2x128xf32>
    %19 = arith.addf %15, %18 : vector<1x2x2x128xf32>
    %c0_14 = arith.constant 0 : index
    %c0_15 = arith.constant 0 : index
    %c0_16 = arith.constant 0 : index
    %c0_17 = arith.constant 0 : index
    %20 = vector.load %arg4[%c0_14, %c0_15, %c0_16, %c0_17] : memref<1x2x2x128xf32, #tpu.memory_space<vmem>>, vector<1x2x2x128xf32>
    tpu.vector_store %arg4[%c0_14, %c0_15, %c0_16, %c0_17], %19 {strides = array<i32>} : memref<1x2x2x128xf32, #tpu.memory_space<vmem>>, vector<1x2x2x128xf32>,
    return
  }
  func.func @transform_0(%arg0: i32, %arg1: i32) -> (i32, i32, i32, i32) {
    %c1_i32 = arith.constant 1 : i32
    %0 = arith.muli %arg0, %c1_i32 : i32
    %1 = arith.addi %0, %arg1 : i32
    %c0_i32 = arith.constant 0 : i32
    %c0_i32_0 = arith.constant 0 : i32
    %c0_i32_1 = arith.constant 0 : i32
    %c0_i32_2 = arith.constant 0 : i32
    return %c0_i32, %c0_i32_0, %1, %c0_i32_1 : i32, i32, i32, i32
  }
  func.func @transform_1(%arg0: i32, %arg1: i32) -> (i32, i32, i32, i32) {
    %c1_i32 = arith.constant 1 : i32
    %0 = arith.muli %arg0, %c1_i32 : i32
    %1 = arith.addi %0, %arg1 : i32
    %c0_i32 = arith.constant 0 : i32
    %c0_i32_0 = arith.constant 0 : i32
    %c0_i32_1 = arith.constant 0 : i32
    %c0_i32_2 = arith.constant 0 : i32
    return %c0_i32, %c0_i32_0, %1, %c0_i32_1 : i32, i32, i32, i32
  }
  func.func @transform_2(%arg0: i32, %arg1: i32) -> (i32, i32, i32, i32) {
    %c0_i32 = arith.constant 0 : i32
    %c0_i32_0 = arith.constant 0 : i32
    %c0_i32_1 = arith.constant 0 : i32
    %c0_i32_2 = arith.constant 0 : i32
    return %arg0, %c0_i32, %c0_i32_0, %c0_i32_1 : i32, i32, i32, i32
  }
}

</mosaic_0001>

<bundles_post_ra>
// kernel: tpu_custom_call.1
= control target key start
LH: loop header
LB: loop body
LE: loop exit
PB: predicated region body
PF: predicated region fallthrough
CT: control target
= control target key end

     0   :  { %7 = vsyncpa [#allocation3], 0  ;;  %s334_s0 = inlined_call_operand.hbm [shape: f32[2,4,2,128], index: 0, kind: input, shape index: {}]   ;;  %s335_s1 = inlined_call_operand.hbm [shape: f32[2,4,2,128], index: 1, kind: input, shape index: {}]   ;;  %s336_s2 = inlined_call_operand.hbm [shape: f32[1,2,2,128], index: 2, kind: output, shape index: {}]  }
   0x1   :  { %8 = vsyncpa [#allocation6], 0 }
   0x2   :  { %9 = vsyncpa [#allocation4], 0  ;;  %s271_s9 = smov [#allocation2]  }
   0x3   :  { %s18_s10 = sshll.u32 %s271_s9, 4  ;;  %s19_s10 = int_to_ptr.vmem [resolvable:$true] %s18_s10 }
   0x4   :  { %s213_s11 = scalar_lea.vmem %s19_s10, 256  ;;  %p218_p1 = scmp.lt.s32.totalorder %s19_s10, %s19_s10 }
   0x5   :  { %p214_p0 = scmp.ne.s32.totalorder %s19_s10, %s213_s11  ;;  %p219_p2 = scmp.lt.s32.totalorder %s213_s11, %s213_s11 }
   0x7   :  { %p220_p3 = por %p219_p2, %p218_p1 }
   0x9   :  { %p221_p4 = pnand %p220_p3, %p214_p0 }
   0xb   :  { %224 = shalt.err (!%p221_p4)
}
   0xc   :  { %s272_s12 = smov 32   ;;  %s273_s13 = smov 2  }
   0xd   :  { %24 = dma.hbm_to_vmem [thread:$0]  %s334_s0, 256, %s19_s10, [#allocation3], %s272_s12, %s272_s12, %s273_s13  }
   0xe   :  { %s274_s16 = smov [#allocation5]  }
   0xf   :  { %s33_s17 = sshll.u32 %s274_s16, 4  ;;  %s34_s17 = int_to_ptr.vmem [resolvable:$true] %s33_s17 }
  0x10   :  { %s233_s18 = scalar_lea.vmem %s34_s17, 256  ;;  %p238_p6 = scmp.lt.s32.totalorder %s34_s17, %s34_s17 }
  0x11   :  { %p234_p5 = scmp.ne.s32.totalorder %s34_s17, %s233_s18  ;;  %p239_p7 = scmp.lt.s32.totalorder %s233_s18, %s233_s18 }
  0x13   :  { %p240_p8 = por %p239_p7, %p238_p6 }
  0x15   :  { %p241_p9 = pnand %p240_p8, %p234_p5 }
  0x17   :  { %244 = shalt.err (!%p241_p9)
}
  0x18   :  { %39 = dma.hbm_to_vmem [thread:$0]  %s335_s1, 256, %s34_s17, [#allocation6], %s272_s12, %s272_s12, %s273_s13  }
  0x19   :  { %265 = dma.done.wait [#allocation3], 256  }
  0x1a   :  { %266 = vsyncadd [#allocation3], 4294967040 }
  0x1b   :  { %267 = dma.done.wait [#allocation6], 256  }
  0x1c   :  { %268 = vsyncadd [#allocation6], 4294967040  ;;  %v275_v0 = vmov 0.0   ;;  %vm70_vm0 = vcmask 1041408   ;;  %v54_v1 = vld [vmem:[#allocation2] sm:$0x3] }
  0x1d   :  { %52 = vst [vmem:[#allocation7] sm:$0x3] %v275_v0  ;;  %53 = vst [vmem:[#allocation7 + $0x2] sm:$0x3] %v275_v0  ;;  %v55_v2 = vld [vmem:[#allocation2 + $0x2] sm:$0x3] }
  0x1e   :  { %v56_v3 = vld [vmem:[#allocation2 + $0x4] sm:$0x3]  ;;  %v57_v4 = vld [vmem:[#allocation2 + $0x6] sm:$0x3]  ;;  %v71_v5 = vsel %vm70_vm0, %v54_v1, -inf  ;;  %v72_v6 = vsel %vm70_vm0, %v55_v2, -inf }
  0x1f   :  { %v73_v7 = vsel %vm70_vm0, %v56_v3, -inf  ;;  %v75_v8 = vsel %vm70_vm0, %v57_v4, -inf  ;;  %v58_v9 = vld [vmem:[#allocation2 + $0x8] sm:$0x3]  ;;  %v59_v12 = vld [vmem:[#allocation2 + $0xa] sm:$0x3] }
  0x20   :  { %v74_v10 = vmax.f32 %v71_v5, %v73_v7  ;;  %v76_v11 = vmax.f32 %v72_v6, %v75_v8  ;;  %v60_v13 = vld [vmem:[#allocation2 + $0xc] sm:$0x3]  ;;  %v61_v14 = vld [vmem:[#allocation2 + $0xe] sm:$0x3]  ;;  %v78_v16 = vsel %vm70_vm0, %v58_v9, -inf  ;;  %v79_v17 = vsel %vm70_vm0, %v59_v12, -inf }
  0x21   :  { %v80_v18 = vsel %vm70_vm0, %v60_v13, -inf  ;;  %v82_v20 = vsel %vm70_vm0, %v61_v14, -inf  ;;  %v62_v61 = vld [vmem:[#allocation5] sm:$0x3]  ;;  %v63_v63 = vld [vmem:[#allocation5 + $0x2] sm:$0x3] }
  0x22   :  { %v77_v15 = vmax.f32 %v74_v10, %v76_v11  ;;  %v81_v19 = vmax.f32 %v78_v16, %v80_v18  ;;  %v83_v25 = vmax.f32 %v79_v17, %v82_v20  ;;  %v64_v0 = vld [vmem:[#allocation5 + $0x4] sm:$0x3]  ;;  %v66_v10 = vld [vmem:[#allocation5 + $0x8] sm:$0x3]  ;;  %v67_v11 = vld [vmem:[#allocation5 + $0xa] sm:$0x3] }
  0x23   :  { %v68_v16 = vld [vmem:[#allocation5 + $0xc] sm:$0x3]  ;;  %v69_v18 = vld [vmem:[#allocation5 + $0xe] sm:$0x3]  ;;  %s276_s0 = smov [#allocation7]  }
  0x24   :  { %v85_v21 = vsub.f32 %v54_v1, %v77_v15  ;;  %v86_v22 = vsub.f32 %v55_v2, %v77_v15  ;;  %v87_v23 = vsub.f32 %v56_v3, %v77_v15  ;;  %v88_v24 = vsub.f32 %v57_v4, %v77_v15  ;;  %v65_v1 = vld [vmem:[#allocation5 + $0x6] sm:$0x3]  ;;  %s166_s1 = sshll.u32 %s276_s0, 4  ;;  %s167_s1 = int_to_ptr.vmem [resolvable:$true] %s166_s1 }
  0x25   :  { %v84_v30 = vmax.f32 %v81_v19, %v83_v25  ;;  %s245_s21 = scalar_lea.vmem %s167_s1, 64  ;;  %p250_p11 = scmp.lt.s32.totalorder %s167_s1, %s167_s1 }
  0x26   :  { %v93_v26 = vmul.f32 1.442695, %v85_v21  ;;  %v95_v27 = vmul.f32 1.442695, %v86_v22  ;;  %v97_v28 = vmul.f32 1.442695, %v87_v23  ;;  %p246_p10 = scmp.ne.s32.totalorder %s167_s1, %s245_s21  ;;  %p251_p12 = scmp.lt.s32.totalorder %s245_s21, %s245_s21 }
  0x27   :  { %v99_v29 = vmul.f32 1.442695, %v88_v24  ;;  %v89_v31 = vsub.f32 %v58_v9, %v84_v30  ;;  %v90_v32 = vsub.f32 %v59_v12, %v84_v30  ;;  %v91_v33 = vsub.f32 %v60_v13, %v84_v30 }
  0x28   :  { %185 = vpow2.f32 %v93_v26  ;;  %v92_v34 = vsub.f32 %v61_v14, %v84_v30  ;;  %p252_p13 = por %p251_p12, %p250_p11 }
  0x29   :  { %187 = vpow2.f32 %v95_v27  ;;  %v101_v35 = vmul.f32 1.442695, %v89_v31  ;;  %v103_v36 = vmul.f32 1.442695, %v90_v32  ;;  %v105_v37 = vmul.f32 1.442695, %v91_v33 }
  0x2a   :  { %189 = vpow2.f32 %v97_v28  ;;  %v107_v38 = vmul.f32 1.442695, %v92_v34  ;;  %v133_v28 = vld [vmem:[#allocation7] sm:$0x3]  ;;  %p253_p0 = pnand %p252_p13, %p246_p10 }
  0x2b   :  { %191 = vpow2.f32 %v99_v29 }
  0x2c   :  { %193 = vpow2.f32 %v101_v35 }
  0x2d   :  { %195 = vpow2.f32 %v103_v36 }
  0x2e   :  { %197 = vpow2.f32 %v105_v37 }
  0x2f   :  { %199 = vpow2.f32 %v107_v38  ;;  %v134_v38 = vld [vmem:[#allocation7 + $0x2] sm:$0x3] }
  0x35   :  { %v186_v39 = vpop.eup %185 }
  0x36   :  { %v188_v40 = vpop.eup %187  ;;  %v109_v41 = vsel %vm70_vm0, %v186_v39, 0.0 }
  0x37   :  { %v190_v42 = vpop.eup %189  ;;  %v110_v43 = vsel %vm70_vm0, %v188_v40, 0.0 }
  0x38   :  { %v192_v44 = vpop.eup %191  ;;  %v111_v45 = vadd.f32 %v110_v43, %v109_v41  ;;  %v112_v46 = vsel %vm70_vm0, %v190_v42, 0.0 }
  0x39   :  { %v114_v47 = vsel %vm70_vm0, %v192_v44, 0.0  ;;  %v194_v48 = vpop.eup %193 }
  0x3a   :  { %v113_v49 = vadd.f32 %v112_v46, %v111_v45  ;;  %v196_v50 = vpop.eup %195  ;;  %v116_v51 = vsel %vm70_vm0, %v194_v48, 0.0 }
  0x3b   :  { %v198_v52 = vpop.eup %197  ;;  %v117_v54 = vsel %vm70_vm0, %v196_v50, 0.0 }
  0x3c   :  { %v115_v53 = vadd.f32 %v114_v47, %v113_v49  ;;  %v200_v55 = vpop.eup %199  ;;  %v118_v56 = vadd.f32 %v117_v54, %v116_v51  ;;  %v119_v57 = vsel %vm70_vm0, %v198_v52, 0.0 }
  0x3d   :  { %v121_v58 = vsel %vm70_vm0, %v200_v55, 0.0 }
  0x3e   :  { %201 = vrcp.f32 %v115_v53  ;;  %v120_v59 = vadd.f32 %v119_v57, %v118_v56 }
  0x40   :  { %v122_v60 = vadd.f32 %v121_v58, %v120_v59 }
  0x42   :  { %203 = vrcp.f32 %v122_v60 }
  0x4b   :  { %v202_v62 = vpop.eup %201 }
  0x4c   :  { %v125_v2 = vmul.f32 %v202_v62, %v186_v39  ;;  %v126_v3 = vmul.f32 %v202_v62, %v188_v40  ;;  %v127_v4 = vmul.f32 %v202_v62, %v190_v42  ;;  %v128_v5 = vmul.f32 %v202_v62, %v192_v44 }
  0x4e   :  { %v135_v6 = vmul.f32 %v125_v2, %v62_v61  ;;  %v136_v7 = vmul.f32 %v126_v3, %v63_v63  ;;  %v137_v8 = vmul.f32 %v127_v4, %v64_v0  ;;  %v138_v9 = vmul.f32 %v128_v5, %v65_v1 }
  0x4f   :  { %v204_v12 = vpop.eup %203 }
  0x50   :  { %v143_v13 = vsel %vm70_vm0, %v135_v6, 0.0  ;;  %v144_v14 = vsel %vm70_vm0, %v136_v7, 0.0  ;;  %v146_v15 = vsel %vm70_vm0, %v137_v8, 0.0  ;;  %v129_v19 = vmul.f32 %v204_v12, %v194_v48 }
  0x51   :  { %v145_v17 = vadd.f32 %v144_v14, %v143_v13  ;;  %v130_v20 = vmul.f32 %v204_v12, %v196_v50  ;;  %v131_v21 = vmul.f32 %v204_v12, %v198_v52  ;;  %v148_v22 = vsel %vm70_vm0, %v138_v9, 0.0 }
  0x52   :  { %v132_v23 = vmul.f32 %v204_v12, %v200_v55  ;;  %v139_v25 = vmul.f32 %v129_v19, %v66_v10 }
  0x53   :  { %v147_v24 = vadd.f32 %v146_v15, %v145_v17  ;;  %v140_v26 = vmul.f32 %v130_v20, %v67_v11  ;;  %v141_v27 = vmul.f32 %v131_v21, %v68_v16 }
  0x54   :  { %v142_v29 = vmul.f32 %v132_v23, %v69_v18  ;;  %v150_v31 = vsel %vm70_vm0, %v139_v25, 0.0 }
  0x55   :  { %v149_v30 = vadd.f32 %v148_v22, %v147_v24  ;;  %v151_v32 = vsel %vm70_vm0, %v140_v26, 0.0  ;;  %v153_v33 = vsel %vm70_vm0, %v141_v27, 0.0 }
  0x56   :  { %v152_v34 = vadd.f32 %v151_v32, %v150_v31  ;;  %v155_v36 = vsel %vm70_vm0, %v142_v29, 0.0 }
  0x57   :  { %v157_v35 = vadd.f32 %v149_v30, %v133_v28 }
  0x58   :  { %v154_v37 = vadd.f32 %v153_v33, %v152_v34 }
  0x59   :  { %159 = vst [vmem:[#allocation7] sm:$0x3] %v157_v35 }
  0x5a   :  { %v156_v39 = vadd.f32 %v155_v36, %v154_v37 }
  0x5c   :  { %v158_v40 = vadd.f32 %v156_v39, %v134_v38 }
  0x5e   :  { %160 = vst [vmem:[#allocation7 + $0x2] sm:$0x3] %v158_v40 }
  0x5f   :  { %256 = shalt.err (!%p253_p0)
}
  0x60   :  { %172 = dma.vmem_to_hbm [thread:$0]  %s167_s1, 64, %s336_s2, [#allocation4], %s272_s12, %s272_s12, %s273_s13  }
  0x61   :  { %269 = dma.done.wait [#allocation4], 64  }
  0x62   :  { %270 = vsyncadd [#allocation4], 4294967232 }
  0x63   :  { %176 = vsyncpa [#allocation3], 1 }
  0x64   :  { %177 = vsyncpa [#allocation6], 1 }
  0x65   :  { %178 = vsyncpa [#allocation4], 1 }

</bundles_post_ra>
